<compile_context>
chip_gen: v7x
topology: tpu7x:2x2x1
jax: 0.10.0
libtpu: 0.0.40
codegen_flags: <defaults>
</compile_context>

<pallas_src>
import numpy as np
import jax
import jax.numpy as jnp
from jax.experimental import pallas as pl
from jax.experimental.pallas import tpu as pltpu

_H1, _H2 = 512, 256
_NPAD = 128  # lane-dense width for the padded final (256 -> 1) layer


def _disc_kernel(x_ref, w1_ref, b1_ref, w2_ref, b2_ref, w3_ref, b3_ref, out_ref):
    # x tile: (TB, Dp) f32 -> bf16 for the MXU; accumulate in f32.
    x = x_ref[...].astype(jnp.bfloat16)

    # Linear(D, 512) + LeakyReLU(0.2)
    h1 = jnp.dot(x, w1_ref[...], preferred_element_type=jnp.float32) + b1_ref[...]
    h1 = jnp.where(h1 > 0, h1, 0.2 * h1)

    # Linear(512, 256) + LeakyReLU(0.2)
    h2 = jnp.dot(h1.astype(jnp.bfloat16), w2_ref[...],
                 preferred_element_type=jnp.float32) + b2_ref[...]
    h2 = jnp.where(h2 > 0, h2, 0.2 * h2)

    # Linear(256, 1) + Sigmoid, computed lane-dense on 128 padded columns.
    h3 = jnp.dot(h2.astype(jnp.bfloat16), w3_ref[...],
                 preferred_element_type=jnp.float32) + b3_ref[...]
    out_ref[...] = jax.nn.sigmoid(h3)


def _round_up(v, m):
    return -(-v // m) * m


def _pick_tb(B, Dp, budget_bytes=24 << 20):
    """Batch tile: multiple of 8; double-buffered x/out tiles + live activations
    must fit a conservative VMEM budget (v7x has 64 MiB physical)."""
    tb = 1024
    while tb > 8 and (2 * tb * (Dp + _NPAD) + tb * (_H1 + _H2)) * 4 > budget_bytes:
        tb //= 2
    tb = max(8, tb)
    return min(tb, _round_up(B, 8))


def discriminator_forward(img, params, *, tb=None):
    """img: (B, C, H, W) float32. Returns validity (B, 1) float32."""
    B = img.shape[0]
    x = img.reshape(B, -1).astype(jnp.float32)          # same as torch .view
    D = x.shape[1]
    w1, b1, w2, b2, w3, b3 = params

    # Lane-align the input-feature axis (zero rows of w1 keep matmul exact).
    Dp = _round_up(D, 128)
    if Dp != D:
        x = jnp.pad(x, ((0, 0), (0, Dp - D)))
        w1 = jnp.pad(w1, ((0, Dp - D), (0, 0)))

    # Lane-dense final layer: (256, 1) -> (256, 128), (1, 1) -> (1, 128).
    w3p = jnp.pad(w3, ((0, 0), (0, _NPAD - w3.shape[1])))
    b3p = jnp.pad(b3, ((0, 0), (0, _NPAD - b3.shape[1])))

    # bf16 weights for the MXU (halves resident-weight footprint / DMA).
    w1b = w1.astype(jnp.bfloat16)
    w2b = w2.astype(jnp.bfloat16)
    w3b = w3p.astype(jnp.bfloat16)

    if tb is None:
        tb = _pick_tb(B, Dp)
    b_padded = _round_up(B, tb)
    if b_padded != B:
        x = jnp.pad(x, ((0, b_padded - B), (0, 0)))

    out = pl.pallas_call(
        _disc_kernel,
        out_shape=jax.ShapeDtypeStruct((b_padded, _NPAD), jnp.float32),
        grid=(b_padded // tb,),
        in_specs=[
            pl.BlockSpec((tb, Dp), lambda i: (i, 0)),        # x streams over batch
            pl.BlockSpec((Dp, _H1), lambda i: (0, 0)),       # weights/biases resident
            pl.BlockSpec((1, _H1), lambda i: (0, 0)),
            pl.BlockSpec((_H1, _H2), lambda i: (0, 0)),
            pl.BlockSpec((1, _H2), lambda i: (0, 0)),
            pl.BlockSpec((_H2, _NPAD), lambda i: (0, 0)),
            pl.BlockSpec((1, _NPAD), lambda i: (0, 0)),
        ],
        out_specs=pl.BlockSpec((tb, _NPAD), lambda i: (i, 0)),
        compiler_params=pltpu.CompilerParams(
            dimension_semantics=("parallel",),               # megacore on v7x
            vmem_limit_bytes=48 << 20,                       # headroom on 64 MiB v7x
        ),
    )(x, w1b, b1, w2b, b2, w3b, b3p)

    return out[:B, :1]


def init_params(key, in_features):
    """Deterministic params; shapes match nn.Linear layers (stored transposed)."""
    sizes = [(in_features, _H1), (_H1, _H2), (_H2, 1)]
    params = []
    for i, (fan_in, fan_out) in enumerate(sizes):
        kw, kb = jax.random.split(jax.random.fold_in(key, i))
        bound = 1.0 / np.sqrt(fan_in)
        w = jax.random.uniform(kw, (fan_in, fan_out), jnp.float32, -bound, bound)
        b = jax.random.uniform(kb, (1, fan_out), jnp.float32, -bound, bound)
        params += [w, b]
    return tuple(params)


def _reference_forward(img, params):
    """Plain-JAX reference with the same bf16-matmul / f32-accumulate math."""
    w1, b1, w2, b2, w3, b3 = params
    x = img.reshape(img.shape[0], -1).astype(jnp.float32)
    h1 = jnp.dot(x.astype(jnp.bfloat16), w1.astype(jnp.bfloat16),
                 preferred_element_type=jnp.float32) + b1
    h1 = jnp.where(h1 > 0, h1, 0.2 * h1)
    h2 = jnp.dot(h1.astype(jnp.bfloat16), w2.astype(jnp.bfloat16),
                 preferred_element_type=jnp.float32) + b2
    h2 = jnp.where(h2 > 0, h2, 0.2 * h2)
    h3 = jnp.dot(h2.astype(jnp.bfloat16), w3.astype(jnp.bfloat16),
                 preferred_element_type=jnp.float32) + b3
    return jax.nn.sigmoid(h3)


if __name__ == "__main__":
    key = jax.random.PRNGKey(0)
    img_shape = (1, 16, 16)                                # (C, H, W)
    B = 2
    in_features = int(np.prod(img_shape))                  # 256

    k_img, k_par = jax.random.split(key)
    img = jax.random.normal(k_img, (B,) + img_shape, jnp.float32)
    params = init_params(k_par, in_features)

    fwd = jax.jit(discriminator_forward)
    validity = jax.block_until_ready(fwd(img, params))

    ref = _reference_forward(img, params)
    assert validity.shape == (B, 1)
    np.testing.assert_allclose(np.asarray(validity), np.asarray(ref),
                               rtol=1e-3, atol=1e-3)

    print("KERNEL_OK")
</pallas_src>

<mosaic_0001>
module attributes {stable_mosaic.version = 11 : i64} {
  func.func @_disc_kernel(%arg0: i32, %arg1: memref<8x256xf32, #tpu.memory_space<vmem>>, %arg2: memref<256x512xbf16, #tpu.memory_space<vmem>>, %arg3: memref<1x512xf32, #tpu.memory_space<vmem>>, %arg4: memref<512x256xbf16, #tpu.memory_space<vmem>>, %arg5: memref<1x256xf32, #tpu.memory_space<vmem>>, %arg6: memref<256x128xbf16, #tpu.memory_space<vmem>>, %arg7: memref<1x128xf32, #tpu.memory_space<vmem>>, %arg8: memref<8x128xf32, #tpu.memory_space<vmem>>) attributes {dimension_semantics = [#tpu.dimension_semantics<parallel>], iteration_bounds = array<i64: 1>, scalar_prefetch = 0 : i64, scratch_operands = 0 : i64, tpu.core_type = #tpu.core_type<tc>, window_params = [{transform_indices = @transform_0, window_bounds = array<i64: 8, 256>}, {pipeline_mode = #tpu.pipeline_mode<synchronous>, transform_indices = @transform_1, window_bounds = array<i64: 256, 512>}, {pipeline_mode = #tpu.pipeline_mode<synchronous>, transform_indices = @transform_2, window_bounds = array<i64: 1, 512>}, {pipeline_mode = #tpu.pipeline_mode<synchronous>, transform_indices = @transform_3, window_bounds = array<i64: 512, 256>}, {pipeline_mode = #tpu.pipeline_mode<synchronous>, transform_indices = @transform_4, window_bounds = array<i64: 1, 256>}, {pipeline_mode = #tpu.pipeline_mode<synchronous>, transform_indices = @transform_5, window_bounds = array<i64: 256, 128>}, {pipeline_mode = #tpu.pipeline_mode<synchronous>, transform_indices = @transform_6, window_bounds = array<i64: 1, 128>}, {transform_indices = @transform_7, window_bounds = array<i64: 8, 128>}]} {
    %c0 = arith.constant 0 : index
    %c0_0 = arith.constant 0 : index
    %0 = vector.load %arg1[%c0, %c0_0] : memref<8x256xf32, #tpu.memory_space<vmem>>, vector<8x256xf32>
    %1 = arith.truncf %0 : vector<8x256xf32> to vector<8x256xbf16>
    %c0_1 = arith.constant 0 : index
    %c0_2 = arith.constant 0 : index
    %2 = vector.load %arg2[%c0_1, %c0_2] : memref<256x512xbf16, #tpu.memory_space<vmem>>, vector<256x512xbf16>
    %cst = arith.constant dense<0.000000e+00> : vector<8x512xf32>
    %3 = tpu.matmul %1, %2, %cst {dimension_numbers = #tpu.dot_dimension_numbers<[1], [0], [0], [1], [0, 0, 1, 1], [], []>} : vector<8x256xbf16>, vector<256x512xbf16>, vector<8x512xf32> -> vector<8x512xf32>
    %c0_3 = arith.constant 0 : index
    %c0_4 = arith.constant 0 : index
    %4 = vector.load %arg3[%c0_3, %c0_4] : memref<1x512xf32, #tpu.memory_space<vmem>>, vector<1x512xf32>
    %5 = vector.broadcast %4 : vector<1x512xf32> to vector<8x512xf32>
    %6 = arith.addf %3, %5 : vector<8x512xf32>
    %cst_5 = arith.constant 0.000000e+00 : f32
    %7 = vector.broadcast %cst_5 : f32 to vector<8x512xf32>
    %8 = arith.cmpf ogt, %6, %7 : vector<8x512xf32>
    %cst_6 = arith.constant 2.000000e-01 : f32
    %9 = vector.broadcast %cst_6 : f32 to vector<8x512xf32>
    %10 = arith.mulf %9, %6 : vector<8x512xf32>
    %11 = arith.select %8, %6, %10 : vector<8x512xi1>, vector<8x512xf32>
    %12 = arith.truncf %11 : vector<8x512xf32> to vector<8x512xbf16>
    %c0_7 = arith.constant 0 : index
    %c0_8 = arith.constant 0 : index
    %13 = vector.load %arg4[%c0_7, %c0_8] : memref<512x256xbf16, #tpu.memory_space<vmem>>, vector<512x256xbf16>
    %cst_9 = arith.constant dense<0.000000e+00> : vector<8x256xf32>
    %14 = tpu.matmul %12, %13, %cst_9 {dimension_numbers = #tpu.dot_dimension_numbers<[1], [0], [0], [1], [0, 0, 1, 1], [], []>} : vector<8x512xbf16>, vector<512x256xbf16>, vector<8x256xf32> -> vector<8x256xf32>
    %c0_10 = arith.constant 0 : index
    %c0_11 = arith.constant 0 : index
    %15 = vector.load %arg5[%c0_10, %c0_11] : memref<1x256xf32, #tpu.memory_space<vmem>>, vector<1x256xf32>
    %16 = vector.broadcast %15 : vector<1x256xf32> to vector<8x256xf32>
    %17 = arith.addf %14, %16 : vector<8x256xf32>
    %cst_12 = arith.constant 0.000000e+00 : f32
    %18 = vector.broadcast %cst_12 : f32 to vector<8x256xf32>
    %19 = arith.cmpf ogt, %17, %18 : vector<8x256xf32>
    %cst_13 = arith.constant 2.000000e-01 : f32
    %20 = vector.broadcast %cst_13 : f32 to vector<8x256xf32>
    %21 = arith.mulf %20, %17 : vector<8x256xf32>
    %22 = arith.select %19, %17, %21 : vector<8x256xi1>, vector<8x256xf32>
    %23 = arith.truncf %22 : vector<8x256xf32> to vector<8x256xbf16>
    %c0_14 = arith.constant 0 : index
    %c0_15 = arith.constant 0 : index
    %24 = vector.load %arg6[%c0_14, %c0_15] : memref<256x128xbf16, #tpu.memory_space<vmem>>, vector<256x128xbf16>
    %cst_16 = arith.constant dense<0.000000e+00> : vector<8x128xf32>
    %25 = tpu.matmul %23, %24, %cst_16 {dimension_numbers = #tpu.dot_dimension_numbers<[1], [0], [0], [1], [0, 0, 1, 1], [], []>} : vector<8x256xbf16>, vector<256x128xbf16>, vector<8x128xf32> -> vector<8x128xf32>
    %c0_17 = arith.constant 0 : index
    %c0_18 = arith.constant 0 : index
    %26 = vector.load %arg7[%c0_17, %c0_18] : memref<1x128xf32, #tpu.memory_space<vmem>>, vector<1x128xf32>
    %27 = vector.broadcast %26 : vector<1x128xf32> to vector<8x128xf32>
    %28 = arith.addf %25, %27 : vector<8x128xf32>
    %29 = arith.negf %28 : vector<8x128xf32>
    %30 = math.exp %29 : vector<8x128xf32>
    %cst_19 = arith.constant 1.000000e+00 : f32
    %31 = vector.broadcast %cst_19 : f32 to vector<8x128xf32>
    %32 = arith.addf %31, %30 : vector<8x128xf32>
    %33 = arith.divf %31, %32 : vector<8x128xf32>
    %c0_20 = arith.constant 0 : index
    %c0_21 = arith.constant 0 : index
    %34 = vector.load %arg8[%c0_20, %c0_21] : memref<8x128xf32, #tpu.memory_space<vmem>>, vector<8x128xf32>
    tpu.vector_store %arg8[%c0_20, %c0_21], %33 {strides = array<i32>} : memref<8x128xf32, #tpu.memory_space<vmem>>, vector<8x128xf32>,
    return
  }
  func.func @transform_0(%arg0: i32) -> (i32, i32) {
    %c0_i32 = arith.constant 0 : i32
    %c0_i32_0 = arith.constant 0 : i32
    return %arg0, %c0_i32 : i32, i32
  }
  func.func @transform_1(%arg0: i32) -> (i32, i32) {
    %c0_i32 = arith.constant 0 : i32
    %c0_i32_0 = arith.constant 0 : i32
    %c0_i32_1 = arith.constant 0 : i32
    return %c0_i32, %c0_i32_0 : i32, i32
  }
  func.func @transform_2(%arg0: i32) -> (i32, i32) {
    %c0_i32 = arith.constant 0 : i32
    %c0_i32_0 = arith.constant 0 : i32
    %c0_i32_1 = arith.constant 0 : i32
    return %c0_i32, %c0_i32_0 : i32, i32
  }
  func.func @transform_3(%arg0: i32) -> (i32, i32) {
    %c0_i32 = arith.constant 0 : i32
    %c0_i32_0 = arith.constant 0 : i32
    %c0_i32_1 = arith.constant 0 : i32
    return %c0_i32, %c0_i32_0 : i32, i32
  }
  func.func @transform_4(%arg0: i32) -> (i32, i32) {
    %c0_i32 = arith.constant 0 : i32
    %c0_i32_0 = arith.constant 0 : i32
    %c0_i32_1 = arith.constant 0 : i32
    return %c0_i32, %c0_i32_0 : i32, i32
  }
  func.func @transform_5(%arg0: i32) -> (i32, i32) {
    %c0_i32 = arith.constant 0 : i32
    %c0_i32_0 = arith.constant 0 : i32
    %c0_i32_1 = arith.constant 0 : i32
    return %c0_i32, %c0_i32_0 : i32, i32
  }
  func.func @transform_6(%arg0: i32) -> (i32, i32) {
    %c0_i32 = arith.constant 0 : i32
    %c0_i32_0 = arith.constant 0 : i32
    %c0_i32_1 = arith.constant 0 : i32
    return %c0_i32, %c0_i32_0 : i32, i32
  }
  func.func @transform_7(%arg0: i32) -> (i32, i32) {
    %c0_i32 = arith.constant 0 : i32
    %c0_i32_0 = arith.constant 0 : i32
    return %arg0, %c0_i32 : i32, i32
  }
}

</mosaic_0001>

<bundles_post_ra>
// kernel: discriminator_forward.1
= control target key start
LH: loop header
LB: loop body
LE: loop exit
PB: predicated region body
PF: predicated region fallthrough
CT: control target
= control target key end

     0   :  { %s2111_s1 = inlined_call_operand.vmem [shape: bf16[256,512], index: 1, kind: input, shape index: {}]   ;;  %s2112_s0 = inlined_call_operand.vmem [shape: f32[8,256], index: 0, kind: input, shape index: {}]   ;;  %s2113_s3 = inlined_call_operand.vmem [shape: bf16[512,256], index: 3, kind: input, shape index: {}]   ;;  %s2114_s5 = inlined_call_operand.vmem [shape: bf16[256,128], index: 5, kind: input, shape index: {}]   ;;  %s2115_s2 = inlined_call_operand.vmem [shape: f32[1,512], index: 2, kind: input, shape index: {}]   ;;  %s2116_s4 = inlined_call_operand.vmem [shape: f32[1,256], index: 4, kind: input, shape index: {}]   ;;  %s2117_s6 = inlined_call_operand.vmem [shape: f32[1,128], index: 6, kind: input, shape index: {}]   ;;  %s2118_s7 = inlined_call_operand.vmem [shape: f32[8,128], index: 7, kind: output, shape index: {}]  }
   0x1   :  { %v1381_v0 = vld [vmem:[%s2111_s1 + $0x4] ss:$16 sps:$4 sm:$0xff]   ;;  %v1383_v1 = vld [vmem:[%s2111_s1] ss:$16 sps:$4 sm:$0xff]   ;;  %v28_v13 = vld [vmem:[%s2112_s0 + $0x8] sm:$0xff] }
   0x2   :  { %437 = vmatprep.subr.bf16.mxu1 %v1381_v0  ;;  %v1384_v2 = vld [vmem:[%s2111_s1 + $0x24] ss:$16 sps:$4 sm:$0xff]   ;;  %v1386_v3 = vld [vmem:[%s2111_s1 + $0x20] ss:$16 sps:$4 sm:$0xff]   ;;  %v1675_v14 = vpack.c.bf16 %v28_v13, %v28_v13  ;;  %v1431_v45 = vld [vmem:[%s2111_s1 + $0xc] ss:$16 sps:$4 sm:$0xff]  }
   0x3   :  { %438 = vmatpush1.bf16.msra.mxu1 %v1383_v1  ;;  %v1387_v4 = vld [vmem:[%s2111_s1 + $0x44] ss:$16 sps:$4 sm:$0xff]   ;;  %v1389_v5 = vld [vmem:[%s2111_s1 + $0x40] ss:$16 sps:$4 sm:$0xff]   ;;  %v1429_v47 = vld [vmem:[%s2111_s1 + $0x8] ss:$16 sps:$4 sm:$0xff]  }
   0x4   :  { %439 = vmatprep.subr.bf16.mxu1 %v1384_v2  ;;  %v1390_v6 = vld [vmem:[%s2111_s1 + $0x64] ss:$16 sps:$4 sm:$0xff]   ;;  %v1392_v7 = vld [vmem:[%s2111_s1 + $0x60] ss:$16 sps:$4 sm:$0xff]   ;;  %469 = vmatprep.mubr.bf16.mxu1 %v1675_v14  ;;  %v1434_v49 = vld [vmem:[%s2111_s1 + $0x2c] ss:$16 sps:$4 sm:$0xff]  }
   0x5   :  { %v1393_v8 = vld [vmem:[%s2111_s1 + $0x84] ss:$16 sps:$4 sm:$0xff]   ;;  %v1395_v9 = vld [vmem:[%s2111_s1 + $0x80] ss:$16 sps:$4 sm:$0xff]   ;;  %v1432_v52 = vld [vmem:[%s2111_s1 + $0x28] ss:$16 sps:$4 sm:$0xff]  }
   0x6   :  { %v1396_v10 = vld [vmem:[%s2111_s1 + $0xa4] ss:$16 sps:$4 sm:$0xff]   ;;  %v1398_v11 = vld [vmem:[%s2111_s1 + $0xa0] ss:$16 sps:$4 sm:$0xff]   ;;  %v1437_v53 = vld [vmem:[%s2111_s1 + $0x4c] ss:$16 sps:$4 sm:$0xff]  }
   0x7   :  { %440 = vmatpush1.bf16.msra.mxu1 %v1386_v3  ;;  %v1399_v12 = vld [vmem:[%s2111_s1 + $0xc4] ss:$16 sps:$4 sm:$0xff]   ;;  %v1401_v15 = vld [vmem:[%s2111_s1 + $0xc0] ss:$16 sps:$4 sm:$0xff]   ;;  %v1435_v56 = vld [vmem:[%s2111_s1 + $0x48] ss:$16 sps:$4 sm:$0xff]  }
   0x8   :  { %441 = vmatprep.subr.bf16.mxu1 %v1387_v4  ;;  %v1402_v16 = vld [vmem:[%s2111_s1 + $0xe4] ss:$16 sps:$4 sm:$0xff]   ;;  %v1404_v17 = vld [vmem:[%s2111_s1 + $0xe0] ss:$16 sps:$4 sm:$0xff]   ;;  %v1440_v57 = vld [vmem:[%s2111_s1 + $0x6c] ss:$16 sps:$4 sm:$0xff]  }
   0x9   :  { %v1405_v18 = vld [vmem:[%s2111_s1 + $0x104] ss:$16 sps:$4 sm:$0xff]   ;;  %v1407_v19 = vld [vmem:[%s2111_s1 + $0x100] ss:$16 sps:$4 sm:$0xff]   ;;  %v1438_v60 = vld [vmem:[%s2111_s1 + $0x68] ss:$16 sps:$4 sm:$0xff]  }
   0xa   :  { %v1408_v20 = vld [vmem:[%s2111_s1 + $0x124] ss:$16 sps:$4 sm:$0xff]   ;;  %v1410_v21 = vld [vmem:[%s2111_s1 + $0x120] ss:$16 sps:$4 sm:$0xff]   ;;  %v1443_v61 = vld [vmem:[%s2111_s1 + $0x8c] ss:$16 sps:$4 sm:$0xff]  }
   0xb   :  { %442 = vmatpush1.bf16.msra.mxu1 %v1389_v5  ;;  %v1411_v22 = vld [vmem:[%s2111_s1 + $0x144] ss:$16 sps:$4 sm:$0xff]   ;;  %v1413_v23 = vld [vmem:[%s2111_s1 + $0x140] ss:$16 sps:$4 sm:$0xff]   ;;  %v1441_v0 = vld [vmem:[%s2111_s1 + $0x88] ss:$16 sps:$4 sm:$0xff]  }
   0xc   :  { %443 = vmatprep.subr.bf16.mxu1 %v1390_v6  ;;  %v1414_v24 = vld [vmem:[%s2111_s1 + $0x164] ss:$16 sps:$4 sm:$0xff]   ;;  %v1416_v25 = vld [vmem:[%s2111_s1 + $0x160] ss:$16 sps:$4 sm:$0xff]   ;;  %v1446_v1 = vld [vmem:[%s2111_s1 + $0xac] ss:$16 sps:$4 sm:$0xff]  }
   0xd   :  { %v1417_v26 = vld [vmem:[%s2111_s1 + $0x184] ss:$16 sps:$4 sm:$0xff]   ;;  %v1479_v28 = vld [vmem:[%s2113_s3] ss:$8 sps:$4 sm:$0xff]   ;;  %v1482_v31 = vld [vmem:[%s2113_s3 + $0x10] ss:$8 sps:$4 sm:$0xff]  }
   0xe   :  { %v1477_v27 = vld [vmem:[%s2113_s3 + $0x4] ss:$8 sps:$4 sm:$0xff]   ;;  %v1480_v29 = vld [vmem:[%s2113_s3 + $0x14] ss:$8 sps:$4 sm:$0xff]   ;;  %v1419_v30 = vld [vmem:[%s2111_s1 + $0x180] ss:$16 sps:$4 sm:$0xff]  }
   0xf   :  { %444 = vmatpush1.bf16.msra.mxu1 %v1392_v7  ;;  %931 = vmatprep.subr.bf16.mxu0 %v1477_v27  ;;  %v1420_v32 = vld [vmem:[%s2111_s1 + $0x1a4] ss:$16 sps:$4 sm:$0xff]   ;;  %v1422_v34 = vld [vmem:[%s2111_s1 + $0x1a0] ss:$16 sps:$4 sm:$0xff]   ;;  %v1444_v4 = vld [vmem:[%s2111_s1 + $0xa8] ss:$16 sps:$4 sm:$0xff]  }
  0x10   :  { %445 = vmatprep.subr.bf16.mxu1 %v1393_v8  ;;  %932 = vmatpush1.bf16.msra.mxu0 %v1479_v28  ;;  %v1483_v33 = vld [vmem:[%s2113_s3 + $0x24] ss:$8 sps:$4 sm:$0xff]   ;;  %v1485_v35 = vld [vmem:[%s2113_s3 + $0x20] ss:$8 sps:$4 sm:$0xff]   ;;  %v1486_v37 = vld [vmem:[%s2113_s3 + $0x34] ss:$8 sps:$4 sm:$0xff]  }
  0x11   :  { %933 = vmatprep.subr.bf16.mxu0 %v1480_v29  ;;  %v1423_v36 = vld [vmem:[%s2111_s1 + $0x1c4] ss:$16 sps:$4 sm:$0xff]   ;;  %v1425_v38 = vld [vmem:[%s2111_s1 + $0x1c0] ss:$16 sps:$4 sm:$0xff]   ;;  %v1449_v5 = vld [vmem:[%s2111_s1 + $0xcc] ss:$16 sps:$4 sm:$0xff]  }
  0x12   :  { %v1488_v39 = vld [vmem:[%s2113_s3 + $0x30] ss:$8 sps:$4 sm:$0xff]   ;;  %v1426_v40 = vld [vmem:[%s2111_s1 + $0x1e4] ss:$16 sps:$4 sm:$0xff]   ;;  %v1491_v44 = vld [vmem:[%s2113_s3 + $0x40] ss:$8 sps:$4 sm:$0xff]  }
  0x13   :  { %446 = vmatpush1.bf16.msra.mxu1 %v1395_v9  ;;  %v1489_v41 = vld [vmem:[%s2113_s3 + $0x44] ss:$8 sps:$4 sm:$0xff]   ;;  %v1428_v42 = vld [vmem:[%s2111_s1 + $0x1e0] ss:$16 sps:$4 sm:$0xff]   ;;  %v1492_v46 = vld [vmem:[%s2113_s3 + $0x54] ss:$8 sps:$4 sm:$0xff]  }
  0x14   :  { %447 = vmatprep.subr.bf16.mxu1 %v1396_v10  ;;  %934 = vmatpush1.bf16.msra.mxu0 %v1482_v31  ;;  %v27_v43 = vld [vmem:[%s2112_s0] sm:$0xff]  ;;  %v1494_v50 = vld [vmem:[%s2113_s3 + $0x50] ss:$8 sps:$4 sm:$0xff]   ;;  %v1498_v55 = vld [vmem:[%s2113_s3 + $0x74] ss:$8 sps:$4 sm:$0xff]  }
  0x15   :  { %935 = vmatprep.subr.bf16.mxu0 %v1483_v33  ;;  %v1777_v48 = vpack.c.bf16 %v27_v43, %v27_v43  ;;  %v1495_v51 = vld [vmem:[%s2113_s3 + $0x64] ss:$8 sps:$4 sm:$0xff]   ;;  %v1497_v54 = vld [vmem:[%s2113_s3 + $0x60] ss:$8 sps:$4 sm:$0xff]   ;;  %v1500_v58 = vld [vmem:[%s2113_s3 + $0x70] ss:$8 sps:$4 sm:$0xff]  }
  0x16   :  { %v1501_v59 = vld [vmem:[%s2113_s3 + $0x84] ss:$8 sps:$4 sm:$0xff]   ;;  %v1503_v62 = vld [vmem:[%s2113_s3 + $0x80] ss:$8 sps:$4 sm:$0xff]   ;;  %v1504_v63 = vld [vmem:[%s2113_s3 + $0x94] ss:$8 sps:$4 sm:$0xff]  }
  0x17   :  { %448 = vmatpush1.bf16.msra.mxu1 %v1398_v11  ;;  %v1506_v2 = vld [vmem:[%s2113_s3 + $0x90] ss:$8 sps:$4 sm:$0xff]   ;;  %v1507_v3 = vld [vmem:[%s2113_s3 + $0xa4] ss:$8 sps:$4 sm:$0xff]   ;;  %v1509_v6 = vld [vmem:[%s2113_s3 + $0xa0] ss:$8 sps:$4 sm:$0xff]  }
  0x18   :  { %449 = vmatprep.subr.bf16.mxu1 %v1399_v12  ;;  %936 = vmatpush1.bf16.msra.mxu0 %v1485_v35  ;;  %v1510_v7 = vld [vmem:[%s2113_s3 + $0xb4] ss:$8 sps:$4 sm:$0xff]   ;;  %v1447_v8 = vld [vmem:[%s2111_s1 + $0xc8] ss:$16 sps:$4 sm:$0xff]   ;;  %v1513_v11 = vld [vmem:[%s2113_s3 + $0xc4] ss:$8 sps:$4 sm:$0xff]  }
  0x19   :  { %937 = vmatprep.subr.bf16.mxu0 %v1486_v37  ;;  %v1452_v9 = vld [vmem:[%s2111_s1 + $0xec] ss:$16 sps:$4 sm:$0xff]   ;;  %v1512_v10 = vld [vmem:[%s2113_s3 + $0xb0] ss:$8 sps:$4 sm:$0xff]   ;;  %v1521_v33 = vld [vmem:[%s2113_s3 + $0xe0] ss:$8 sps:$4 sm:$0xff]  }
  0x1a   :  { %v1450_v12 = vld [vmem:[%s2111_s1 + $0xe8] ss:$16 sps:$4 sm:$0xff]   ;;  %v1455_v13 = vld [vmem:[%s2111_s1 + $0x10c] ss:$16 sps:$4 sm:$0xff]   ;;  %v1573_v37 = vld [vmem:[%s2114_s5 + $0x40] sm:$0xff]  }
  0x1b   :  { %450 = vmatpush1.bf16.msra.mxu1 %v1401_v15  ;;  %v1516_v15 = vld [vmem:[%s2113_s3 + $0xd4] ss:$8 sps:$4 sm:$0xff]   ;;  %v1468_v27 = vld [vmem:[%s2111_s1 + $0x1a8] ss:$16 sps:$4 sm:$0xff]  }
  0x1c   :  { %451 = vmatprep.subr.bf16.mxu1 %v1402_v16  ;;  %938 = vmatpush1.bf16.msra.mxu0 %v1488_v39  ;;  %v1453_v16 = vld [vmem:[%s2111_s1 + $0x108] ss:$16 sps:$4 sm:$0xff]   ;;  %v1473_v28 = vld [vmem:[%s2111_s1 + $0x1cc] ss:$16 sps:$4 sm:$0xff]  }
  0x1d   :  { %939 = vmatprep.subr.bf16.mxu0 %v1489_v41  ;;  %v1471_v29 = vld [vmem:[%s2111_s1 + $0x1c8] ss:$16 sps:$4 sm:$0xff]   ;;  %v1577_v41 = vld [vmem:[%s2114_s5 + $0x50] sm:$0xff]  }
  0x1e   :  { %v1474_v31 = vld [vmem:[%s2111_s1 + $0x1e8] ss:$16 sps:$4 sm:$0xff]  }
  0x1f   :  { %452 = vmatpush1.bf16.msra.mxu1 %v1404_v17  ;;  %v1458_v17 = vld [vmem:[%s2111_s1 + $0x12c] ss:$16 sps:$4 sm:$0xff]   ;;  %v1524_v35 = vld [vmem:[%s2113_s3 + $0xf0] ss:$8 sps:$4 sm:$0xff]  }
  0x20   :  { %453 = vmatprep.subr.bf16.mxu1 %v1405_v18  ;;  %940 = vmatpush1.bf16.msra.mxu0 %v1491_v44  ;;  %v1518_v18 = vld [vmem:[%s2113_s3 + $0xd0] ss:$8 sps:$4 sm:$0xff]   ;;  %v1575_v39 = vld [vmem:[%s2114_s5 + $0x48] sm:$0xff]  }
  0x21   :  { %941 = vmatprep.subr.bf16.mxu0 %v1492_v46  ;;  %v1579_v43 = vld [vmem:[%s2114_s5 + $0x58] sm:$0xff]   ;;  %v1582_v46 = vld [vmem:[%s2114_s5 + $0x20] sm:$0xff]  }
  0x22   :  { %v1580_v44 = vld [vmem:[%s2114_s5 + $0x18] sm:$0xff]  }
  0x23   :  { %454 = vmatpush1.bf16.msra.mxu1 %v1407_v19  ;;  %v1456_v19 = vld [vmem:[%s2111_s1 + $0x128] ss:$16 sps:$4 sm:$0xff]  }
  0x24   :  { %455 = vmatprep.subr.bf16.mxu1 %v1408_v20  ;;  %942 = vmatpush1.bf16.msra.mxu0 %v1494_v50  ;;  %v1461_v20 = vld [vmem:[%s2111_s1 + $0x14c] ss:$16 sps:$4 sm:$0xff]  }
  0x25   :  { %943 = vmatprep.subr.bf16.mxu0 %v1495_v51 }
  0x27   :  { %456 = vmatpush1.bf16.msra.mxu1 %v1410_v21  ;;  %v1459_v21 = vld [vmem:[%s2111_s1 + $0x148] ss:$16 sps:$4 sm:$0xff]  }
  0x28   :  { %457 = vmatprep.subr.bf16.mxu1 %v1411_v22  ;;  %944 = vmatpush1.bf16.msra.mxu0 %v1497_v54  ;;  %v1464_v22 = vld [vmem:[%s2111_s1 + $0x16c] ss:$16 sps:$4 sm:$0xff]  }
  0x29   :  { %945 = vmatprep.subr.bf16.mxu0 %v1498_v55 }
  0x2b   :  { %458 = vmatpush1.bf16.msra.mxu1 %v1413_v23  ;;  %v1462_v23 = vld [vmem:[%s2111_s1 + $0x168] ss:$16 sps:$4 sm:$0xff]  }
  0x2c   :  { %459 = vmatprep.subr.bf16.mxu1 %v1414_v24  ;;  %946 = vmatpush1.bf16.msra.mxu0 %v1500_v58  ;;  %v1467_v24 = vld [vmem:[%s2111_s1 + $0x18c] ss:$16 sps:$4 sm:$0xff]  }
  0x2d   :  { %947 = vmatprep.subr.bf16.mxu0 %v1501_v59 }
  0x2f   :  { %460 = vmatpush1.bf16.msra.mxu1 %v1416_v25  ;;  %v1465_v25 = vld [vmem:[%s2111_s1 + $0x188] ss:$16 sps:$4 sm:$0xff]  }
  0x30   :  { %461 = vmatprep.subr.bf16.mxu1 %v1417_v26  ;;  %948 = vmatpush1.bf16.msra.mxu0 %v1503_v62  ;;  %v1470_v26 = vld [vmem:[%s2111_s1 + $0x1ac] ss:$16 sps:$4 sm:$0xff]  }
  0x31   :  { %949 = vmatprep.subr.bf16.mxu0 %v1504_v63 }
  0x33   :  { %462 = vmatpush1.bf16.msra.mxu1 %v1419_v30  ;;  %v1476_v30 = vld [vmem:[%s2111_s1 + $0x1ec] ss:$16 sps:$4 sm:$0xff]  }
  0x34   :  { %463 = vmatprep.subr.bf16.mxu1 %v1420_v32  ;;  %950 = vmatpush1.bf16.msra.mxu0 %v1506_v2  ;;  %v1519_v32 = vld [vmem:[%s2113_s3 + $0xe4] ss:$8 sps:$4 sm:$0xff]  }
  0x35   :  { %951 = vmatprep.subr.bf16.mxu0 %v1507_v3  ;;  %v1525_v3 = vld [vmem:[%s2113_s3 + $0x100] ss:$8 sps:$4 sm:$0xff]  }
  0x37   :  { %464 = vmatpush1.bf16.msra.mxu1 %v1422_v34  ;;  %v1522_v34 = vld [vmem:[%s2113_s3 + $0xf4] ss:$8 sps:$4 sm:$0xff]  }
  0x38   :  { %465 = vmatprep.subr.bf16.mxu1 %v1423_v36  ;;  %952 = vmatpush1.bf16.msra.mxu0 %v1509_v6  ;;  %v1527_v36 = vld [vmem:[%s2113_s3 + $0x104] ss:$8 sps:$4 sm:$0xff]   ;;  %v1528_v6 = vld [vmem:[%s2113_s3 + $0x110] ss:$8 sps:$4 sm:$0xff]  }
  0x39   :  { %953 = vmatprep.subr.bf16.mxu0 %v1510_v7  ;;  %v1533_v7 = vld [vmem:[%s2113_s3 + $0x124] ss:$8 sps:$4 sm:$0xff]  }
  0x3b   :  { %466 = vmatpush1.bf16.msra.mxu1 %v1425_v38  ;;  %v1574_v38 = vld [vmem:[%s2114_s5] sm:$0xff]  }
  0x3c   :  { %467 = vmatprep.subr.bf16.mxu1 %v1426_v40  ;;  %954 = vmatpush1.bf16.msra.mxu0 %v1512_v10  ;;  %v1576_v40 = vld [vmem:[%s2114_s5 + $0x8] sm:$0xff]   ;;  %v1534_v10 = vld [vmem:[%s2113_s3 + $0x130] ss:$8 sps:$4 sm:$0xff]  }
  0x3d   :  { %955 = vmatprep.subr.bf16.mxu0 %v1513_v11  ;;  %v1539_v11 = vld [vmem:[%s2113_s3 + $0x144] ss:$8 sps:$4 sm:$0xff]  }
  0x3f   :  { %468 = vmatpush1.bf16.msra.mxu1 %v1428_v42  ;;  %v1578_v42 = vld [vmem:[%s2114_s5 + $0x10] sm:$0xff]  }
  0x40   :  { %478 = vmatprep.subr.bf16.mxu1 %v1431_v45  ;;  %v1581_v45 = vld [vmem:[%s2114_s5 + $0x60] sm:$0xff]  }
  0x42   :  { %470 = vmatmul.mubr.bf16.vlgmr.msra.gmra.mrb[0].mxu1 %v1777_v48 }
  0x43   :  { %479 = vmatpush1.bf16.msra.mxu1 %v1429_v47  ;;  %510 = vmatprep.mubr.bf16.mxu1 %v1675_v14  ;;  %v1515_v14 = vld [vmem:[%s2113_s3 + $0xc0] ss:$8 sps:$4 sm:$0xff]  }
  0x44   :  { %480 = vmatprep.subr.bf16.mxu1 %v1434_v49  ;;  %956 = vmatpush1.bf16.msra.mxu0 %v1515_v14  ;;  %v1583_v47 = vld [vmem:[%s2114_s5 + $0x68] sm:$0xff]   ;;  %v97_v49 = vlaneseq  ;;  %v1540_v14 = vld [vmem:[%s2113_s3 + $0x150] ss:$8 sps:$4 sm:$0xff]  }
  0x45   :  { %957 = vmatprep.subr.bf16.mxu0 %v1516_v15  ;;  %v1545_v15 = vld [vmem:[%s2113_s3 + $0x164] ss:$8 sps:$4 sm:$0xff]  }
  0x46   :  { %v1974_v50 = vshrl.u32 %v97_v49, 7 }
  0x47   :  { %481 = vmatpush1.bf16.msra.mxu1 %v1432_v52  ;;  %v1980_v52 = vld [vmem:[%s2115_s2] sm:$0xf] }
  0x48   :  { %482 = vmatprep.subr.bf16.mxu1 %v1437_v53  ;;  %958 = vmatpush1.bf16.msra.mxu0 %v1518_v18  ;;  %v99_v51 = vsub.s32 0, %v1974_v50  ;;  %v103_v53 = vsub.s32 1, %v1974_v50  ;;  %v1546_v18 = vld [vmem:[%s2113_s3 + $0x170] ss:$8 sps:$4 sm:$0xff]  }
  0x49   :  { %959 = vmatprep.subr.bf16.mxu0 %v1519_v32  ;;  %v1564_v32 = vld [vmem:[%s2113_s3 + $0x1d0] ss:$8 sps:$4 sm:$0xff]  }
  0x4a   :  { %v100_v54 = vrot.slane %v1980_v52, %v99_v51  ;;  %v104_v55 = vrot.slane %v1980_v52, %v103_v53 }
  0x4b   :  { %483 = vmatpush1.bf16.msra.mxu1 %v1435_v56 }
  0x4c   :  { %484 = vmatprep.subr.bf16.mxu1 %v1440_v57  ;;  %960 = vmatpush1.bf16.msra.mxu0 %v1521_v33  ;;  %v1569_v33 = vld [vmem:[%s2113_s3 + $0x1e4] ss:$8 sps:$4 sm:$0xff]  }
  0x4d   :  { %961 = vmatprep.subr.bf16.mxu0 %v1522_v34 }
  0x4f   :  { %485 = vmatpush1.bf16.msra.mxu1 %v1438_v60 }
  0x50   :  { %486 = vmatprep.subr.bf16.mxu1 %v1443_v61  ;;  %962 = vmatpush1.bf16.msra.mxu0 %v1524_v35 }
  0x51   :  { %972 = vmatprep.subr.bf16.mxu0 %v1527_v36  ;;  %v1567_v36 = vld [vmem:[%s2113_s3 + $0x1e0] ss:$8 sps:$4 sm:$0xff]  }
  0x53   :  { %487 = vmatpush1.bf16.msra.mxu1 %v1441_v0 }
  0x54   :  { %488 = vmatprep.subr.bf16.mxu1 %v1446_v1 }
  0x57   :  { %489 = vmatpush1.bf16.msra.mxu1 %v1444_v4 }
  0x58   :  { %490 = vmatprep.subr.bf16.mxu1 %v1449_v5  ;;  %v1530_v5 = vld [vmem:[%s2113_s3 + $0x114] ss:$8 sps:$4 sm:$0xff]  }
  0x5b   :  { %491 = vmatpush1.bf16.msra.mxu1 %v1447_v8  ;;  %v1531_v8 = vld [vmem:[%s2113_s3 + $0x120] ss:$8 sps:$4 sm:$0xff]  }
  0x5c   :  { %492 = vmatprep.subr.bf16.mxu1 %v1452_v9  ;;  %v1536_v9 = vld [vmem:[%s2113_s3 + $0x134] ss:$8 sps:$4 sm:$0xff]  }
  0x5f   :  { %493 = vmatpush1.bf16.msra.mxu1 %v1450_v12  ;;  %v1537_v12 = vld [vmem:[%s2113_s3 + $0x140] ss:$8 sps:$4 sm:$0xff]  }
  0x60   :  { %494 = vmatprep.subr.bf16.mxu1 %v1455_v13  ;;  %v1542_v13 = vld [vmem:[%s2113_s3 + $0x154] ss:$8 sps:$4 sm:$0xff]  }
  0x63   :  { %495 = vmatpush1.bf16.msra.mxu1 %v1453_v16  ;;  %v1543_v16 = vld [vmem:[%s2113_s3 + $0x160] ss:$8 sps:$4 sm:$0xff]  }
  0x64   :  { %496 = vmatprep.subr.bf16.mxu1 %v1458_v17  ;;  %v1548_v17 = vld [vmem:[%s2113_s3 + $0x174] ss:$8 sps:$4 sm:$0xff]  }
  0x67   :  { %497 = vmatpush1.bf16.msra.mxu1 %v1456_v19  ;;  %v1551_v19 = vld [vmem:[%s2113_s3 + $0x184] ss:$8 sps:$4 sm:$0xff]  }
  0x68   :  { %498 = vmatprep.subr.bf16.mxu1 %v1461_v20  ;;  %v1549_v20 = vld [vmem:[%s2113_s3 + $0x180] ss:$8 sps:$4 sm:$0xff]  }
  0x6b   :  { %499 = vmatpush1.bf16.msra.mxu1 %v1459_v21  ;;  %v1554_v21 = vld [vmem:[%s2113_s3 + $0x194] ss:$8 sps:$4 sm:$0xff]  }
  0x6c   :  { %500 = vmatprep.subr.bf16.mxu1 %v1464_v22  ;;  %v1552_v22 = vld [vmem:[%s2113_s3 + $0x190] ss:$8 sps:$4 sm:$0xff]  }
  0x6f   :  { %501 = vmatpush1.bf16.msra.mxu1 %v1462_v23  ;;  %v1557_v23 = vld [vmem:[%s2113_s3 + $0x1a4] ss:$8 sps:$4 sm:$0xff]  }
  0x70   :  { %502 = vmatprep.subr.bf16.mxu1 %v1467_v24  ;;  %v1555_v24 = vld [vmem:[%s2113_s3 + $0x1a0] ss:$8 sps:$4 sm:$0xff]  }
  0x73   :  { %503 = vmatpush1.bf16.msra.mxu1 %v1465_v25  ;;  %v1560_v25 = vld [vmem:[%s2113_s3 + $0x1b4] ss:$8 sps:$4 sm:$0xff]  }
  0x74   :  { %504 = vmatprep.subr.bf16.mxu1 %v1470_v26  ;;  %v1558_v26 = vld [vmem:[%s2113_s3 + $0x1b0] ss:$8 sps:$4 sm:$0xff]  }
  0x77   :  { %505 = vmatpush1.bf16.msra.mxu1 %v1468_v27  ;;  %v1563_v27 = vld [vmem:[%s2113_s3 + $0x1c4] ss:$8 sps:$4 sm:$0xff]  }
  0x78   :  { %506 = vmatprep.subr.bf16.mxu1 %v1473_v28  ;;  %v1561_v28 = vld [vmem:[%s2113_s3 + $0x1c0] ss:$8 sps:$4 sm:$0xff]  }
  0x7b   :  { %507 = vmatpush1.bf16.msra.mxu1 %v1471_v29  ;;  %v1566_v29 = vld [vmem:[%s2113_s3 + $0x1d4] ss:$8 sps:$4 sm:$0xff]  }
  0x7c   :  { %508 = vmatprep.subr.bf16.mxu1 %v1476_v30  ;;  %v107_v30 = vsub.s32 2, %v1974_v50 }
  0x7e   :  { %v108_v34 = vrot.slane %v1980_v52, %v107_v30 }
  0x7f   :  { %509 = vmatpush1.bf16.msra.mxu1 %v1474_v31  ;;  %v111_v31 = vsub.s32 3, %v1974_v50  ;;  %v1335_v50 = vld [vmem:[%s2117_s6] ss:$0 sm:$0xff] }
  0x80   :  { %1353 = vmatprep.subr.bf16.mxu1 %v1573_v37 }
  0x81   :  { %v112_v35 = vrot.slane %v1980_v52, %v111_v31 }
  0x82   :  { %511 = vmatmul.mubr.bf16.vlgmr.msra.gmra.mrb[4].mxu1 %v1777_v48  ;;  %v1584_v48 = vld [vmem:[%s2114_s5 + $0x28] sm:$0xff]  }
  0x83   :  { %1354 = vmatpush3.bf16.msra.mxu1 %v1574_v38  ;;  %v1572_v38 = vld [vmem:[%s2113_s3 + $0x1f4] ss:$8 sps:$4 sm:$0xff]  }
  0x84   :  { %1355 = vmatprep.subr.bf16.mxu1 %v1575_v39 }
  0x87   :  { %1356 = vmatpush3.bf16.msra.mxu1 %v1576_v40 }
  0x88   :  { %1357 = vmatprep.subr.bf16.mxu1 %v1577_v41 }
  0x8b   :  { %1358 = vmatpush3.bf16.msra.mxu1 %v1578_v42 }
  0x8c   :  { %1359 = vmatprep.subr.bf16.mxu1 %v1579_v43 }
  0x8f   :  { %1360 = vmatpush3.bf16.msra.mxu1 %v1580_v44 }
  0x90   :  { %1361 = vmatprep.subr.bf16.mxu1 %v1581_v45  ;;  %v1570_v45 = vld [vmem:[%s2113_s3 + $0x1f0] ss:$8 sps:$4 sm:$0xff]  }
  0x93   :  { %1362 = vmatpush3.bf16.msra.mxu1 %v1582_v46 }
  0x94   :  { %1363 = vmatprep.subr.bf16.mxu1 %v1583_v47 }
  0x97   :  { %1364 = vmatpush3.bf16.msra.mxu1 %v1584_v48 }
 0x115   :  { %v471_v56 = vpop.f32.mrb[0].mxu1 }
 0x116   :  { %v472_v57 = vadd.f32 %v471_v56, %v100_v54  ;;  %v473_v58 = vpop.f32.mrb[1].mxu1  ;;  %v1585_v54 = vld [vmem:[%s2114_s5 + $0x70] sm:$0xff]   ;;  %v1587_v56 = vld [vmem:[%s2114_s5 + $0x78] sm:$0xff]  }
 0x117   :  { %v474_v59 = vadd.f32 %v473_v58, %v104_v55  ;;  %v475_v60 = vpop.f32.mrb[2].mxu1  ;;  %v1586_v55 = vld [vmem:[%s2114_s5 + $0x30] sm:$0xff]   ;;  %1365 = vmatprep.subr.bf16.mxu1 %v1585_v54  ;;  %v599_v58 = vld [vmem:[%s2116_s4] sm:$0x3] }
 0x118   :  { %vm519_vm0 = vcmp.gt.f32.partialorder %v472_v57, 0.0  ;;  %v523_v61 = vmul.f32 0.2, %v472_v57  ;;  %v476_v62 = vpop.f32.mrb[3].mxu1  ;;  %1366 = vmatpush3.bf16.msra.mxu1 %v1586_v55  ;;  %v608_v60 = vrot.slane %v599_v58, %v103_v53 }
 0x119   :  { %vm520_vm1 = vcmp.gt.f32.partialorder %v474_v59, 0.0  ;;  %v524_v63 = vmul.f32 0.2, %v474_v59  ;;  %1367 = vmatprep.subr.bf16.mxu1 %v1587_v56 }
 0x11a   :  { %v527_v0 = vsel %vm519_vm0, %v472_v57, %v523_v61  ;;  %v1588_v57 = vld [vmem:[%s2114_s5 + $0x38] sm:$0xff]  }
 0x11b   :  { %v528_v1 = vsel %vm520_vm1, %v474_v59, %v524_v63  ;;  %v531_v4 = vpack.c.bf16 %v527_v0, %v527_v0  ;;  %v604_v59 = vrot.slane %v599_v58, %v99_v51 }
 0x11c   :  { %v532_v2 = vpack.c.bf16 %v528_v1, %v528_v1  ;;  %1368 = vmatpush3.bf16.msra.mxu1 %v1588_v57 }
 0x11e   :  { %963 = vmatprep.mubr.bf16.mxu0 %v532_v2 }
 0x11f   :  { %964 = vmatmul.mubr.bf16.vlgmr.msra.gmra.mrb[0].mxu0 %v531_v4 }
 0x120   :  { %973 = vmatpush1.bf16.msra.mxu0 %v1525_v3 }
 0x121   :  { %974 = vmatprep.subr.bf16.mxu0 %v1530_v5 }
 0x124   :  { %975 = vmatpush1.bf16.msra.mxu0 %v1528_v6 }
 0x125   :  { %976 = vmatprep.subr.bf16.mxu0 %v1533_v7 }
 0x128   :  { %977 = vmatpush1.bf16.msra.mxu0 %v1531_v8 }
 0x129   :  { %978 = vmatprep.subr.bf16.mxu0 %v1536_v9 }
 0x12c   :  { %979 = vmatpush1.bf16.msra.mxu0 %v1534_v10 }
 0x12d   :  { %980 = vmatprep.subr.bf16.mxu0 %v1539_v11 }
 0x130   :  { %981 = vmatpush1.bf16.msra.mxu0 %v1537_v12 }
 0x131   :  { %982 = vmatprep.subr.bf16.mxu0 %v1542_v13 }
 0x134   :  { %983 = vmatpush1.bf16.msra.mxu0 %v1540_v14 }
 0x135   :  { %984 = vmatprep.subr.bf16.mxu0 %v1545_v15 }
 0x138   :  { %985 = vmatpush1.bf16.msra.mxu0 %v1543_v16 }
 0x139   :  { %986 = vmatprep.subr.bf16.mxu0 %v1548_v17 }
 0x13c   :  { %987 = vmatpush1.bf16.msra.mxu0 %v1546_v18 }
 0x13d   :  { %988 = vmatprep.subr.bf16.mxu0 %v1551_v19 }
 0x140   :  { %989 = vmatpush1.bf16.msra.mxu0 %v1549_v20 }
 0x141   :  { %990 = vmatprep.subr.bf16.mxu0 %v1554_v21 }
 0x144   :  { %991 = vmatpush1.bf16.msra.mxu0 %v1552_v22 }
 0x145   :  { %992 = vmatprep.subr.bf16.mxu0 %v1557_v23 }
 0x148   :  { %993 = vmatpush1.bf16.msra.mxu0 %v1555_v24 }
 0x149   :  { %994 = vmatprep.subr.bf16.mxu0 %v1560_v25 }
 0x14c   :  { %995 = vmatpush1.bf16.msra.mxu0 %v1558_v26 }
 0x14d   :  { %996 = vmatprep.subr.bf16.mxu0 %v1563_v27 }
 0x150   :  { %997 = vmatpush1.bf16.msra.mxu0 %v1561_v28 }
 0x151   :  { %998 = vmatprep.subr.bf16.mxu0 %v1566_v29 }
 0x154   :  { %999 = vmatpush1.bf16.msra.mxu0 %v1564_v32 }
 0x155   :  { %v512_v37 = vpop.f32.mrb[4].mxu1  ;;  %1000 = vmatprep.subr.bf16.mxu0 %v1569_v33 }
 0x156   :  { %v513_v39 = vadd.f32 %v512_v37, %v108_v34  ;;  %v514_v40 = vpop.f32.mrb[5].mxu1 }
 0x157   :  { %v515_v41 = vadd.f32 %v514_v40, %v112_v35  ;;  %v516_v42 = vpop.f32.mrb[6].mxu1 }
 0x158   :  { %vm521_vm2 = vcmp.gt.f32.partialorder %v513_v39, 0.0  ;;  %v525_v43 = vmul.f32 0.2, %v513_v39  ;;  %v517_v44 = vpop.f32.mrb[7].mxu1  ;;  %1001 = vmatpush1.bf16.msra.mxu0 %v1567_v36 }
 0x159   :  { %vm522_vm3 = vcmp.gt.f32.partialorder %v515_v41, 0.0  ;;  %v526_v46 = vmul.f32 0.2, %v515_v41  ;;  %1002 = vmatprep.subr.bf16.mxu0 %v1572_v38 }
 0x15a   :  { %v529_v47 = vsel %vm521_vm2, %v513_v39, %v525_v43 }
 0x15b   :  { %v530_v48 = vsel %vm522_vm3, %v515_v41, %v526_v46  ;;  %v533_v52 = vpack.c.bf16 %v529_v47, %v529_v47 }
 0x15c   :  { %1003 = vmatpush1.bf16.msra.mxu0 %v1570_v45  ;;  %v534_v49 = vpack.c.bf16 %v530_v48, %v530_v48 }
 0x15e   :  { %1004 = vmatprep.mubr.bf16.mxu0 %v534_v49 }
 0x15f   :  { %1005 = vmatmul.mubr.bf16.vlgmr.msra.gmra.mrb[0].mxu0 %v533_v52 }
 0x232   :  { %v1006_v61 = vpop.f32.mrb[0].mxu0 }
 0x233   :  { %v1375_v62 = vadd.f32 %v1006_v61, %v604_v59  ;;  %v1008_v63 = vpop.f32.mrb[1].mxu0 }
 0x234   :  { %v1376_v0 = vadd.f32 %v1008_v63, %v608_v60  ;;  %v1010_v1 = vpop.f32.mrb[2].mxu0 }
 0x235   :  { %vm1013_vm4 = vcmp.gt.f32.partialorder %v1375_v62, 0.0  ;;  %v1015_v2 = vmul.f32 0.2, %v1375_v62  ;;  %v1011_v3 = vpop.f32.mrb[3].mxu0 }
 0x236   :  { %vm1014_vm5 = vcmp.gt.f32.partialorder %v1376_v0, 0.0  ;;  %v1016_v4 = vmul.f32 0.2, %v1376_v0 }
 0x237   :  { %v1017_v5 = vsel %vm1013_vm4, %v1375_v62, %v1015_v2 }
 0x238   :  { %v1018_v6 = vsel %vm1014_vm5, %v1376_v0, %v1016_v4  ;;  %v1019_v8 = vpack.c.bf16 %v1017_v5, %v1017_v5 }
 0x239   :  { %v1020_v7 = vpack.c.bf16 %v1018_v6, %v1018_v6 }
 0x23b   :  { %1188 = vmatprep.mubr.bf16.mxu1 %v1020_v7 }
 0x23c   :  { %1189 = vmatmul.mubr.bf16.vlgmr.msra.gmra.mrb[8].mxu1 %v1019_v8 }
 0x30f   :  { %v1369_v51 = vpop.f32.mrb[8].mxu1 }
 0x310   :  { %v1370_v53 = vpop.f32.mrb[9].mxu1 }
 0x311   :  { %v1371_v9 = vadd.f32 %v1370_v53, %v1369_v51  ;;  %v1372_v10 = vpop.f32.mrb[10].mxu1 }
 0x312   :  { %v1373_v11 = vpop.f32.mrb[11].mxu1 }
 0x313   :  { %v1191_v12 = vadd.f32 %v1371_v9, %v1335_v50 }
 0x315   :  { %v1352_v13 = vmul.f32 -1.442695, %v1191_v12 }
 0x317   :  { %1589 = vpow2.f32 %v1352_v13 }
 0x321   :  { %v1590_v14 = vpop.eup %1589 }
 0x322   :  { %v1199_v15 = vadd.f32 1.0, %v1590_v14 }
 0x324   :  { %1591 = vrcp.f32 %v1199_v15 }
 0x32e   :  { %v1592_v16 = vpop.eup %1591 }
 0x32f   :  { %1202 = vst [vmem:[%s2118_s7] sm:$0xff] %v1592_v16 }

</bundles_post_ra>
